<compile_context>
chip_gen: v5e
topology: v5e:2x2
jax: 0.10.0
libtpu: 0.0.40
codegen_flags: <defaults>
</compile_context>

<pallas_src>
import functools

import jax
import jax.numpy as jnp
from jax.experimental import pallas as pl
from jax.experimental.pallas import tpu as pltpu


# ----------------------------------------------------------------------------
# Hot kernel: sigmoid-BCE mask loss + dice loss over compacted matched rows,
# tiled over the voxel axis.  Grid = (bs, n_query_blocks, n_voxel_tiles).
# ----------------------------------------------------------------------------
def _mask_dice_kernel(x_ref, gt_ref, cam_ref, tid_ref,
                      mask_out, dice_out,
                      ce_acc, num_acc, den_acc,
                      *, inv_v, n_lane_groups):
    vt = pl.program_id(2)
    nvt = pl.num_programs(2)

    @pl.when(vt == 0)
    def _init():
        ce_acc[...] = jnp.zeros_like(ce_acc)
        num_acc[...] = jnp.zeros_like(num_acc)
        den_acc[...] = jnp.zeros_like(den_acc)

    x = x_ref[0].astype(jnp.float32)        # (QB, Vt) matched-row mask logits
    gt = gt_ref[0]                          # (1, Vt)  int32 voxel instance labels
    cam = cam_ref[0].astype(jnp.float32)    # (1, Vt)  camera visibility (0/1), int8 in HBM
    tid = tid_ref[0]                        # (QB, 1)  int32 matched instance id (-1 = padding row)

    # Binary target built in-register: t[q, v] = (voxel label == matched id of row q).
    t = (gt == tid).astype(jnp.float32)     # (QB, Vt)

    # One exp shared between the stable BCE-with-logits and the sigmoid; the
    # 1/(1+e) goes to the EUP via approx reciprocal (mostly free slot).
    e = jnp.exp(-jnp.abs(x))
    softplus = jnp.log1p(e)
    inv = pl.reciprocal(1.0 + e, approx=True)
    s = jnp.where(x >= 0.0, inv, e * inv)   # sigmoid(x), numerically stable
    bce = jnp.maximum(x, 0.0) - x * t + softplus

    ce_w = bce * cam
    num_w = (s * t) * cam
    den_w = (s + t) * cam                   # fused dice denominator

    # Lane-wide accumulation: pure VPU adds over static 128-lane groups into
    # (QB, 128) scratch; cross-lane (XLU) reduce deferred to the finalize step.
    ce_p = ce_acc[...]
    num_p = num_acc[...]
    den_p = den_acc[...]
    for g in range(n_lane_groups):
        lo = g * 128
        ce_p = ce_p + ce_w[:, lo:lo + 128]
        num_p = num_p + num_w[:, lo:lo + 128]
        den_p = den_p + den_w[:, lo:lo + 128]
    ce_acc[...] = ce_p
    num_acc[...] = num_p
    den_acc[...] = den_p

    @pl.when(vt == nvt - 1)
    def _finalize():
        w = (tid >= 0).astype(jnp.float32)                            # (QB, 1) valid-row mask
        ce_rows = jnp.sum(ce_acc[...], axis=-1, keepdims=True) * inv_v
        mask_out[0, 0] = jnp.sum(ce_rows * w, axis=0, keepdims=True)  # (1, 1)
        num_rows = jnp.sum(num_acc[...], axis=-1, keepdims=True)
        den_rows = jnp.sum(den_acc[...], axis=-1, keepdims=True)
        dice_rows = 1.0 - (2.0 * num_rows + 1.0) / (den_rows + 1.0)
        dice_out[0, 0] = jnp.sum(dice_rows * w, axis=0, keepdims=True)


def _round_up(x, m):
    return ((x + m - 1) // m) * m


def _vmem_limits():
    """Generation-aware (double-buffered stream budget, vmem_limit_bytes)."""
    cap = None
    try:
        cap = getattr(pltpu.get_tpu_info(), "vmem_capacity_bytes", None)
    except Exception:
        cap = None
    if cap is None or cap <= (80 << 20):    # v7x-class: 64 MiB VMEM per TensorCore
        return 20 << 20, 44 << 20
    return 44 << 20, 96 << 20               # v5e / v6e: 128 MiB VMEM


def _pick_vtile(v, qblock, itemsize, stream_budget, max_vtile):
    """Largest multiple-of-128 voxel tile whose double-buffered streams
    (mask rows + gt int32 + cam int8) fit inside the stream budget."""
    per_col = 2 * (qblock * itemsize + 4 + 1)
    cap = max(128, (stream_budget // per_col) // 128 * 128)
    max_vtile = max(128, (int(max_vtile) // 128) * 128)
    v128 = _round_up(max(int(v), 1), 128)
    return int(min(max_vtile, v128, cap))


def _run_mask_dice_kernel(src, gt_vox, cam, tid, *, v_orig, qblock, vtile, vmem_limit):
    """src: (bs, R, Vp) compacted matched-row logits; gt_vox: (bs, 1, Vp) int32;
    cam: (bs, 1, Vp) int8; tid: (bs, R, 1) int32.  R % qblock == 0, Vp % vtile == 0."""
    bs, r, vp = src.shape
    assert r % qblock == 0 and vp % vtile == 0 and vtile % 128 == 0
    n_qb = r // qblock
    nvt = vp // vtile
    kernel = functools.partial(_mask_dice_kernel,
                               inv_v=1.0 / float(v_orig),
                               n_lane_groups=vtile // 128)
    grid_spec = pltpu.PrefetchScalarGridSpec(
        num_scalar_prefetch=0,
        grid=(bs, n_qb, nvt),
        in_specs=[
            # TODO(synk): add pipeline_mode=pl.Buffered(3) here only if xprof shows
            # exposed DMA on v5e (the kernel should be EUP/VPU-bound).
            pl.BlockSpec((1, qblock, vtile), lambda b, qb, t: (b, qb, t)),
            pl.BlockSpec((1, 1, vtile), lambda b, qb, t: (b, 0, t)),
            pl.BlockSpec((1, 1, vtile), lambda b, qb, t: (b, 0, t)),
            pl.BlockSpec((1, qblock, 1), lambda b, qb, t: (b, qb, 0)),
        ],
        out_specs=[
            pl.BlockSpec((1, 1, 1, 1), lambda b, qb, t: (b, qb, 0, 0)),
            pl.BlockSpec((1, 1, 1, 1), lambda b, qb, t: (b, qb, 0, 0)),
        ],
        scratch_shapes=[pltpu.VMEM((qblock, 128), jnp.float32)] * 3,
    )
    out_shape = (jax.ShapeDtypeStruct((bs, n_qb, 1, 1), jnp.float32),
                 jax.ShapeDtypeStruct((bs, n_qb, 1, 1), jnp.float32))
    mask_p, dice_p = pl.pallas_call(
        kernel,
        out_shape=out_shape,
        grid_spec=grid_spec,
        compiler_params=pltpu.CompilerParams(
            dimension_semantics=("parallel", "parallel", "arbitrary"),
            vmem_limit_bytes=int(vmem_limit)),
    )(src, gt_vox, cam, tid)
    # per-(batch, query-block) partials -> scalar sums in plain JAX
    return jnp.sum(mask_p), jnp.sum(dice_p)


# ----------------------------------------------------------------------------
# Tiny (bs, Q, C) sigmoid focal class loss: plain JAX (per perf review — too small
# to be worth a padded-lane Pallas kernel and an extra launch).
# ----------------------------------------------------------------------------
def _focal_class_loss(class_pred, labels, *, alpha=0.25):
    x = class_pred.astype(jnp.float32)
    t = jax.nn.one_hot(labels, x.shape[-1], dtype=jnp.float32)
    p = jax.nn.sigmoid(x)
    bce = jnp.maximum(x, 0.0) - x * t + jnp.log1p(jnp.exp(-jnp.abs(x)))
    pt = (1.0 - p) * t + p * (1.0 - t)
    focal_w = (alpha * t + (1.0 - alpha) * (1.0 - t)) * (pt * pt)   # gamma == 2 -> pt*pt
    return jnp.sum(bce * focal_w)


# ----------------------------------------------------------------------------
# JAX glue reproducing Mask2FormerLoss.forward semantics.
# ----------------------------------------------------------------------------
class Mask2FormerLossPallas:
    def __init__(self, num_classes, class_names,
                 loss_cls_weight=1.0, loss_mask_weight=1.0,
                 loss_dice_weight=1.0, loss_flow_weight=2.0,
                 no_class_weight=0.1, flow=False, max_vtile=32768):
        self.num_classes = num_classes
        self.class_names = class_names
        self.loss_cls_weight = loss_cls_weight
        self.loss_mask_weight = loss_mask_weight
        self.loss_dice_weight = loss_dice_weight
        self.loss_flow_weight = loss_flow_weight
        self.no_class_weight = no_class_weight
        self.flow = flow
        self.max_vtile = max_vtile
        self.focal_loss_weight = 2.0   # FocalLoss(loss_weight=2.0)
        # empty_weight exists in the torch module but is unused by its FocalLoss
        # call path (weight=ones_like(target) is passed instead).
        self.empty_weight = jnp.ones((num_classes,), jnp.float32).at[-1].set(no_class_weight)

    def __call__(self, mask_pred, class_pred, flow_pred, mask_gt, class_gt,
                 flow_gt, indices, mask_camera):
        bs, q, v = mask_pred.shape

        # avg_factor = clamp(reduce_mean(total GT instances), min=1); single device
        # so reduce_mean is the identity.
        num_total_pos = sum(int(class_gt[b].shape[0]) for b in range(bs))
        avg_factor = float(max(num_total_pos, 1))

        # ---- matched-row compaction (JAX-side gather, padded to 8 sublanes) ----
        nm_list = [int(indices[b][0].shape[0]) for b in range(bs)]
        nm_pad = max(8, _round_up(max(nm_list) if nm_list else 0, 8))
        src_rows, tid_rows, lbl_rows = [], [], []
        for b in range(bs):
            src_idx = jnp.asarray(indices[b][0], jnp.int32)
            tgt_idx = jnp.asarray(indices[b][1], jnp.int32)
            pad = nm_pad - nm_list[b]
            gather_idx = jnp.concatenate([src_idx, jnp.zeros((pad,), jnp.int32)])
            src_rows.append(jnp.take(mask_pred[b], gather_idx, axis=0))
            tid_rows.append(jnp.concatenate([tgt_idx, jnp.full((pad,), -1, jnp.int32)]))
            lbl_rows.append(jnp.full((q,), self.num_classes - 1, jnp.int32)
                            .at[src_idx].set(class_gt[b][tgt_idx].astype(jnp.int32)))
        src = jnp.stack(src_rows)                         # (bs, nm_pad, V) matched rows
        tid = jnp.stack(tid_rows)[:, :, None]             # (bs, nm_pad, 1) int32
        lbl = jnp.stack(lbl_rows)                         # (bs, Q) int32 padded class labels
        gt_vox = mask_gt.astype(jnp.int32)[:, None, :]    # (bs, 1, V) int32
        if mask_camera is not None:
            cam = mask_camera.astype(jnp.int8)[:, None, :]
        else:
            cam = jnp.ones((bs, 1, v), jnp.int8)

        # ---- query-block axis: feed both v7x TensorCores when bs == 1 ----
        qblock = 8 if (bs == 1 and nm_pad >= 16) else nm_pad

        # ---- voxel tiling: generation- & dtype-aware tile, V padded (cam = 0) ----
        stream_budget, vmem_limit = _vmem_limits()
        itemsize = jnp.dtype(mask_pred.dtype).itemsize
        vtile = _pick_vtile(v, qblock, itemsize, stream_budget, self.max_vtile)
        v_pad = _round_up(v, vtile)
        if v_pad != v:
            dv = v_pad - v
            src = jnp.pad(src, ((0, 0), (0, 0), (0, dv)))
            gt_vox = jnp.pad(gt_vox, ((0, 0), (0, 0), (0, dv)), constant_values=-1)
            cam = jnp.pad(cam, ((0, 0), (0, 0), (0, dv)))   # cam = 0 -> zero weight

        mask_sum, dice_sum = _run_mask_dice_kernel(
            src, gt_vox, cam, tid, v_orig=v, qblock=qblock, vtile=vtile,
            vmem_limit=vmem_limit)
        cls_sum = _focal_class_loss(class_pred, lbl)

        loss_masks = self.loss_mask_weight * mask_sum / avg_factor
        loss_dices = self.loss_dice_weight * dice_sum / avg_factor
        loss_classes = (self.loss_cls_weight * self.focal_loss_weight
                        * cls_sum / avg_factor)
        # TODO(synk): flow branch (HybridFlowLoss over matched moving instances)
        # is disabled (flow=False default); loss_flows stays zero.
        loss_flows = jnp.float32(0.0)
        return loss_masks, loss_dices, loss_classes, loss_flows


# ----------------------------------------------------------------------------
# Pure-JAX reference (mirrors the torch math) used as a sanity check.
# ----------------------------------------------------------------------------
def _reference(src, tgt, cam, clsp, clst, avg_factor):
    def bce(x, t):
        return jnp.maximum(x, 0.0) - x * t + jnp.log1p(jnp.exp(-jnp.abs(x)))

    v = src.shape[-1]
    ce = jnp.sum(jnp.sum(bce(src, tgt) * cam, axis=-1) / v) / avg_factor
    s = jax.nn.sigmoid(src)
    numer = 2.0 * jnp.sum(s * tgt * cam, axis=-1)
    denom = jnp.sum(s * cam, axis=-1) + jnp.sum(tgt * cam, axis=-1)
    dice = jnp.sum(1.0 - (numer + 1.0) / (denom + 1.0)) / avg_factor
    p = jax.nn.sigmoid(clsp)
    pt = (1.0 - p) * clst + p * (1.0 - clst)
    fw = (0.25 * clst + 0.75 * (1.0 - clst)) * pt * pt
    fl = jnp.sum(bce(clsp, clst) * fw) / avg_factor * 2.0
    return ce, dice, fl


def _check_case(seed, bs, Q, V, n_inst, num_classes, class_names, indices, max_vtile):
    k = jax.random.split(jax.random.PRNGKey(seed), 7)
    mask_pred = jax.random.normal(k[0], (bs, Q, V), jnp.float32)
    class_pred = jax.random.normal(k[1], (bs, Q, num_classes), jnp.float32)
    flow_pred = jax.random.normal(k[2], (bs, Q, 3), jnp.float32)      # unused (flow=False)
    mask_gt = jax.random.randint(k[3], (bs, V), 0, n_inst, jnp.int32)
    class_gt = jax.random.randint(k[4], (bs, n_inst), 0, num_classes - 1, jnp.int32)
    flow_gt = jax.random.normal(k[5], (bs, V, 3), jnp.float32)        # unused (flow=False)
    mask_camera = jax.random.bernoulli(k[6], 0.8, (bs, V))

    loss_mod = Mask2FormerLossPallas(num_classes=num_classes, class_names=class_names,
                                     max_vtile=max_vtile)
    out = loss_mod(mask_pred, class_pred, flow_pred, mask_gt, class_gt, flow_gt,
                   indices, mask_camera)
    out = jax.block_until_ready(out)
    loss_masks, loss_dices, loss_classes, loss_flows = out

    # pure-JAX reference of the same math (matched rows only)
    src_list, tgt_list, clst_list = [], [], []
    for b in range(bs):
        s_idx, t_idx = indices[b]
        inst = (mask_gt[b][None, :] == jnp.arange(n_inst)[:, None])
        tgt_list.append(inst[t_idx].astype(jnp.float32))
        src_list.append(mask_pred[b][s_idx])
        pad = jnp.full((Q,), num_classes - 1, jnp.int32).at[s_idx].set(class_gt[b][t_idx])
        clst_list.append(jax.nn.one_hot(pad, num_classes, dtype=jnp.float32))
    avg_factor = float(max(bs * n_inst, 1))
    ref = _reference(jnp.stack(src_list), jnp.stack(tgt_list),
                     mask_camera.astype(jnp.float32)[:, None, :],
                     class_pred, jnp.stack(clst_list), avg_factor)
    # approx-reciprocal sigmoid in the kernel -> relaxed tolerance
    assert jnp.allclose(loss_masks, ref[0], rtol=5e-3, atol=5e-3), (loss_masks, ref[0])
    assert jnp.allclose(loss_dices, ref[1], rtol=5e-3, atol=5e-3), (loss_dices, ref[1])
    assert jnp.allclose(loss_classes, ref[2], rtol=5e-3, atol=5e-3), (loss_classes, ref[2])
    assert bool(jnp.isfinite(loss_flows))


if __name__ == "__main__":
    class_names = ["car", "truck", "construction_vehicle", "bus",
                   "trailer", "motorcycle", "bicycle", "empty"]

    # Case 1: bs=2 — batch-parallel grid, 2 voxel tiles (max_vtile=128 forces the
    # multi-tile accumulate + finalize path), 4 matched rows padded to 8.
    indices1 = [
        (jnp.array([2, 5, 1, 7], jnp.int32), jnp.array([0, 1, 2, 3], jnp.int32)),
        (jnp.array([0, 3, 4, 6], jnp.int32), jnp.array([3, 2, 1, 0], jnp.int32)),
    ]
    _check_case(seed=0, bs=2, Q=8, V=256, n_inst=4, num_classes=8,
                class_names=class_names, indices=indices1, max_vtile=128)

    # Case 2: bs=1 — exercises the query-block split (2 blocks of 8 matched rows for
    # the dual-TensorCore path), V padding (300 -> 384) and 3 voxel tiles.
    indices2 = [
        (jnp.arange(0, 32, 2, dtype=jnp.int32),
         jnp.arange(15, -1, -1, dtype=jnp.int32)),
    ]
    _check_case(seed=1, bs=1, Q=32, V=300, n_inst=16, num_classes=8,
                class_names=class_names, indices=indices2, max_vtile=128)

    print("KERNEL_OK")
</pallas_src>

<mosaic_0001>
module attributes {stable_mosaic.version = 11 : i64} {
  func.func @_mask_dice_kernel(%arg0: i32, %arg1: i32, %arg2: i32, %arg3: memref<1x8x128xf32, #tpu.memory_space<vmem>>, %arg4: memref<1x1x128xi32, #tpu.memory_space<vmem>>, %arg5: memref<1x1x128xi8, #tpu.memory_space<vmem>>, %arg6: memref<1x8x1xi32, #tpu.memory_space<vmem>>, %arg7: memref<1x1x1x1xf32, #tpu.memory_space<vmem>>, %arg8: memref<1x1x1x1xf32, #tpu.memory_space<vmem>>, %arg9: memref<8x128xf32, #tpu.memory_space<vmem>>, %arg10: memref<8x128xf32, #tpu.memory_space<vmem>>, %arg11: memref<8x128xf32, #tpu.memory_space<vmem>>) attributes {dimension_semantics = [#tpu.dimension_semantics<parallel>, #tpu.dimension_semantics<parallel>, #tpu.dimension_semantics<arbitrary>], iteration_bounds = array<i64: 2, 1, 2>, scalar_prefetch = 0 : i64, scratch_operands = 3 : i64, tpu.core_type = #tpu.core_type<tc>, window_params = [{transform_indices = @transform_0, window_bounds = array<i64: 1, 8, 128>}, {transform_indices = @transform_1, window_bounds = array<i64: 1, 1, 128>}, {transform_indices = @transform_2, window_bounds = array<i64: 1, 1, 128>}, {transform_indices = @transform_3, window_bounds = array<i64: 1, 8, 1>}, {transform_indices = @transform_4, window_bounds = array<i64: 1, 1, 1, 1>}, {transform_indices = @transform_5, window_bounds = array<i64: 1, 1, 1, 1>}]} {
    %c0_i32 = arith.constant 0 : i32
    %0 = arith.cmpi eq, %arg2, %c0_i32 : i32
    %1 = arith.extui %0 : i1 to i32
    %c0_i32_0 = arith.constant 0 : i32
    %2 = arith.cmpi ne, %1, %c0_i32_0 : i32
    scf.if %2 {
      %cst_28 = arith.constant 0.000000e+00 : f32
      %54 = vector.broadcast %cst_28 : f32 to vector<8x128xf32>
      %c0_29 = arith.constant 0 : index
      %c0_30 = arith.constant 0 : index
      %55 = vector.load %arg9[%c0_29, %c0_30] : memref<8x128xf32, #tpu.memory_space<vmem>>, vector<8x128xf32>
      tpu.vector_store %arg9[%c0_29, %c0_30], %54 {strides = array<i32>} : memref<8x128xf32, #tpu.memory_space<vmem>>, vector<8x128xf32>,
      %cst_31 = arith.constant 0.000000e+00 : f32
      %56 = vector.broadcast %cst_31 : f32 to vector<8x128xf32>
      %c0_32 = arith.constant 0 : index
      %c0_33 = arith.constant 0 : index
      %57 = vector.load %arg10[%c0_32, %c0_33] : memref<8x128xf32, #tpu.memory_space<vmem>>, vector<8x128xf32>
      tpu.vector_store %arg10[%c0_32, %c0_33], %56 {strides = array<i32>} : memref<8x128xf32, #tpu.memory_space<vmem>>, vector<8x128xf32>,
      %cst_34 = arith.constant 0.000000e+00 : f32
      %58 = vector.broadcast %cst_34 : f32 to vector<8x128xf32>
      %c0_35 = arith.constant 0 : index
      %c0_36 = arith.constant 0 : index
      %59 = vector.load %arg11[%c0_35, %c0_36] : memref<8x128xf32, #tpu.memory_space<vmem>>, vector<8x128xf32>
      tpu.vector_store %arg11[%c0_35, %c0_36], %58 {strides = array<i32>} : memref<8x128xf32, #tpu.memory_space<vmem>>, vector<8x128xf32>,
    } else {
    }
    %c0 = arith.constant 0 : index
    %c0_1 = arith.constant 0 : index
    %c0_2 = arith.constant 0 : index
    %3 = vector.load %arg3[%c0, %c0_1, %c0_2] : memref<1x8x128xf32, #tpu.memory_space<vmem>>, vector<1x8x128xf32>
    %4 = vector.shape_cast %3 : vector<1x8x128xf32> to vector<8x128xf32>
    %c0_3 = arith.constant 0 : index
    %c0_4 = arith.constant 0 : index
    %c0_5 = arith.constant 0 : index
    %5 = vector.load %arg4[%c0_3, %c0_4, %c0_5] : memref<1x1x128xi32, #tpu.memory_space<vmem>>, vector<1x1x128xi32>
    %6 = vector.shape_cast %5 : vector<1x1x128xi32> to vector<1x128xi32>
    %c0_6 = arith.constant 0 : index
    %c0_7 = arith.constant 0 : index
    %c0_8 = arith.constant 0 : index
    %7 = vector.load %arg5[%c0_6, %c0_7, %c0_8] : memref<1x1x128xi8, #tpu.memory_space<vmem>>, vector<1x1x128xi8>
    %8 = vector.shape_cast %7 : vector<1x1x128xi8> to vector<1x128xi8>
    %9 = arith.sitofp %8 : vector<1x128xi8> to vector<1x128xf32>
    %c0_9 = arith.constant 0 : index
    %c0_10 = arith.constant 0 : index
    %c0_11 = arith.constant 0 : index
    %10 = vector.load %arg6[%c0_9, %c0_10, %c0_11] : memref<1x8x1xi32, #tpu.memory_space<vmem>>, vector<1x8x1xi32>
    %11 = vector.shape_cast %10 : vector<1x8x1xi32> to vector<8x1xi32>
    %12 = vector.broadcast %6 : vector<1x128xi32> to vector<8x128xi32>
    %13 = vector.broadcast %11 : vector<8x1xi32> to vector<8x128xi32>
    %14 = arith.cmpi eq, %12, %13 : vector<8x128xi32>
    %15 = arith.extui %14 : vector<8x128xi1> to vector<8x128xi32>
    %16 = arith.sitofp %15 : vector<8x128xi32> to vector<8x128xf32>
    %17 = math.absf %4 : vector<8x128xf32>
    %cst = arith.constant 0.000000e+00 : f32
    %18 = vector.broadcast %cst : f32 to vector<8x128xf32>
    %19 = arith.subf %18, %17 : vector<8x128xf32>
    %20 = math.exp %19 : vector<8x128xf32>
    %21 = math.log1p %20 : vector<8x128xf32>
    %cst_12 = arith.constant 1.000000e+00 : f32
    %22 = vector.broadcast %cst_12 : f32 to vector<8x128xf32>
    %23 = arith.addf %22, %20 : vector<8x128xf32>
    %24 = tpu.reciprocal %23 {approx = true} : vector<8x128xf32> -> vector<8x128xf32>
    %cst_13 = arith.constant 0.000000e+00 : f32
    %25 = vector.broadcast %cst_13 : f32 to vector<8x128xf32>
    %26 = arith.cmpf oge, %4, %25 : vector<8x128xf32>
    %27 = arith.mulf %20, %24 : vector<8x128xf32>
    %28 = arith.select %26, %24, %27 : vector<8x128xi1>, vector<8x128xf32>
    %cst_14 = arith.constant 0.000000e+00 : f32
    %29 = vector.broadcast %cst_14 : f32 to vector<8x128xf32>
    %30 = arith.maximumf %4, %29 : vector<8x128xf32>
    %31 = arith.mulf %4, %16 : vector<8x128xf32>
    %32 = arith.subf %30, %31 : vector<8x128xf32>
    %33 = arith.addf %32, %21 : vector<8x128xf32>
    %34 = vector.broadcast %9 : vector<1x128xf32> to vector<8x128xf32>
    %35 = arith.mulf %33, %34 : vector<8x128xf32>
    %36 = arith.mulf %28, %16 : vector<8x128xf32>
    %37 = vector.broadcast %9 : vector<1x128xf32> to vector<8x128xf32>
    %38 = arith.mulf %36, %37 : vector<8x128xf32>
    %39 = arith.addf %28, %16 : vector<8x128xf32>
    %40 = vector.broadcast %9 : vector<1x128xf32> to vector<8x128xf32>
    %41 = arith.mulf %39, %40 : vector<8x128xf32>
    %c0_15 = arith.constant 0 : index
    %c0_16 = arith.constant 0 : index
    %42 = vector.load %arg9[%c0_15, %c0_16] : memref<8x128xf32, #tpu.memory_space<vmem>>, vector<8x128xf32>
    %c0_17 = arith.constant 0 : index
    %c0_18 = arith.constant 0 : index
    %43 = vector.load %arg10[%c0_17, %c0_18] : memref<8x128xf32, #tpu.memory_space<vmem>>, vector<8x128xf32>
    %c0_19 = arith.constant 0 : index
    %c0_20 = arith.constant 0 : index
    %44 = vector.load %arg11[%c0_19, %c0_20] : memref<8x128xf32, #tpu.memory_space<vmem>>, vector<8x128xf32>
    %45 = arith.addf %42, %35 : vector<8x128xf32>
    %46 = arith.addf %43, %38 : vector<8x128xf32>
    %47 = arith.addf %44, %41 : vector<8x128xf32>
    %c0_21 = arith.constant 0 : index
    %c0_22 = arith.constant 0 : index
    %48 = vector.load %arg9[%c0_21, %c0_22] : memref<8x128xf32, #tpu.memory_space<vmem>>, vector<8x128xf32>
    tpu.vector_store %arg9[%c0_21, %c0_22], %45 {strides = array<i32>} : memref<8x128xf32, #tpu.memory_space<vmem>>, vector<8x128xf32>,
    %c0_23 = arith.constant 0 : index
    %c0_24 = arith.constant 0 : index
    %49 = vector.load %arg10[%c0_23, %c0_24] : memref<8x128xf32, #tpu.memory_space<vmem>>, vector<8x128xf32>
    tpu.vector_store %arg10[%c0_23, %c0_24], %46 {strides = array<i32>} : memref<8x128xf32, #tpu.memory_space<vmem>>, vector<8x128xf32>,
    %c0_25 = arith.constant 0 : index
    %c0_26 = arith.constant 0 : index
    %50 = vector.load %arg11[%c0_25, %c0_26] : memref<8x128xf32, #tpu.memory_space<vmem>>, vector<8x128xf32>
    tpu.vector_store %arg11[%c0_25, %c0_26], %47 {strides = array<i32>} : memref<8x128xf32, #tpu.memory_space<vmem>>, vector<8x128xf32>,
    %c1_i32 = arith.constant 1 : i32
    %51 = arith.cmpi eq, %arg2, %c1_i32 : i32
    %52 = arith.extui %51 : i1 to i32
    %c0_i32_27 = arith.constant 0 : i32
    %53 = arith.cmpi ne, %52, %c0_i32_27 : i32
    scf.if %53 {
      %c0_i32_28 = arith.constant 0 : i32
      %54 = vector.broadcast %c0_i32_28 : i32 to vector<8x1xi32>
      %55 = arith.cmpi sge, %11, %54 : vector<8x1xi32>
      %56 = arith.extui %55 : vector<8x1xi1> to vector<8x1xi32>
      %57 = arith.sitofp %56 : vector<8x1xi32> to vector<8x1xf32>
      %c0_29 = arith.constant 0 : index
      %c0_30 = arith.constant 0 : index
      %58 = vector.load %arg9[%c0_29, %c0_30] : memref<8x128xf32, #tpu.memory_space<vmem>>, vector<8x128xf32>
      %cst_31 = arith.constant dense<0.000000e+00> : vector<8xf32>
      %59 = vector.multi_reduction <add>, %58, %cst_31 [1] : vector<8x128xf32> to vector<8xf32>
      %60 = vector.shape_cast %59 : vector<8xf32> to vector<8x1xf32>
      %cst_32 = arith.constant 3.906250e-03 : f32
      %61 = vector.broadcast %cst_32 : f32 to vector<8x1xf32>
      %62 = arith.mulf %60, %61 : vector<8x1xf32>
      %63 = arith.mulf %62, %57 : vector<8x1xf32>
      %cst_33 = arith.constant dense<0.000000e+00> : vector<1xf32>
      %64 = vector.multi_reduction <add>, %63, %cst_33 [0] : vector<8x1xf32> to vector<1xf32>
      %65 = vector.shape_cast %64 : vector<1xf32> to vector<1x1xf32>
      %c0_34 = arith.constant 0 : index
      %c0_35 = arith.constant 0 : index
      %c0_36 = arith.constant 0 : index
      %c0_37 = arith.constant 0 : index
      %66 = vector.load %arg7[%c0_34, %c0_35, %c0_36, %c0_37] : memref<1x1x1x1xf32, #tpu.memory_space<vmem>>, vector<1x1x1x1xf32>
      %67 = vector.shape_cast %66 : vector<1x1x1x1xf32> to vector<1x1xf32>
      %68 = vector.shape_cast %65 : vector<1x1xf32> to vector<1x1x1x1xf32>
      tpu.vector_store %arg7[%c0_34, %c0_35, %c0_36, %c0_37], %68 {strides = array<i32>} : memref<1x1x1x1xf32, #tpu.memory_space<vmem>>, vector<1x1x1x1xf32>,
      %c0_38 = arith.constant 0 : index
      %c0_39 = arith.constant 0 : index
      %69 = vector.load %arg10[%c0_38, %c0_39] : memref<8x128xf32, #tpu.memory_space<vmem>>, vector<8x128xf32>
      %cst_40 = arith.constant dense<0.000000e+00> : vector<8xf32>
      %70 = vector.multi_reduction <add>, %69, %cst_40 [1] : vector<8x128xf32> to vector<8xf32>
      %71 = vector.shape_cast %70 : vector<8xf32> to vector<8x1xf32>
      %c0_41 = arith.constant 0 : index
      %c0_42 = arith.constant 0 : index
      %72 = vector.load %arg11[%c0_41, %c0_42] : memref<8x128xf32, #tpu.memory_space<vmem>>, vector<8x128xf32>
      %cst_43 = arith.constant dense<0.000000e+00> : vector<8xf32>
      %73 = vector.multi_reduction <add>, %72, %cst_43 [1] : vector<8x128xf32> to vector<8xf32>
      %74 = vector.shape_cast %73 : vector<8xf32> to vector<8x1xf32>
      %cst_44 = arith.constant 2.000000e+00 : f32
      %75 = vector.broadcast %cst_44 : f32 to vector<8x1xf32>
      %76 = arith.mulf %75, %71 : vector<8x1xf32>
      %cst_45 = arith.constant 1.000000e+00 : f32
      %77 = vector.broadcast %cst_45 : f32 to vector<8x1xf32>
      %78 = arith.addf %76, %77 : vector<8x1xf32>
      %cst_46 = arith.constant 1.000000e+00 : f32
      %79 = vector.broadcast %cst_46 : f32 to vector<8x1xf32>
      %80 = arith.addf %74, %79 : vector<8x1xf32>
      %81 = arith.divf %78, %80 : vector<8x1xf32>
      %cst_47 = arith.constant 1.000000e+00 : f32
      %82 = vector.broadcast %cst_47 : f32 to vector<8x1xf32>
      %83 = arith.subf %82, %81 : vector<8x1xf32>
      %84 = arith.mulf %83, %57 : vector<8x1xf32>
      %cst_48 = arith.constant dense<0.000000e+00> : vector<1xf32>
      %85 = vector.multi_reduction <add>, %84, %cst_48 [0] : vector<8x1xf32> to vector<1xf32>
      %86 = vector.shape_cast %85 : vector<1xf32> to vector<1x1xf32>
      %c0_49 = arith.constant 0 : index
      %c0_50 = arith.constant 0 : index
      %c0_51 = arith.constant 0 : index
      %c0_52 = arith.constant 0 : index
      %87 = vector.load %arg8[%c0_49, %c0_50, %c0_51, %c0_52] : memref<1x1x1x1xf32, #tpu.memory_space<vmem>>, vector<1x1x1x1xf32>
      %88 = vector.shape_cast %87 : vector<1x1x1x1xf32> to vector<1x1xf32>
      %89 = vector.shape_cast %86 : vector<1x1xf32> to vector<1x1x1x1xf32>
      tpu.vector_store %arg8[%c0_49, %c0_50, %c0_51, %c0_52], %89 {strides = array<i32>} : memref<1x1x1x1xf32, #tpu.memory_space<vmem>>, vector<1x1x1x1xf32>,
    } else {
    }
    return
  }
  func.func @transform_0(%arg0: i32, %arg1: i32, %arg2: i32) -> (i32, i32, i32) {
    %c0_i32 = arith.constant 0 : i32
    return %arg0, %arg1, %arg2 : i32, i32, i32
  }
  func.func @transform_1(%arg0: i32, %arg1: i32, %arg2: i32) -> (i32, i32, i32) {
    %c0_i32 = arith.constant 0 : i32
    %c0_i32_0 = arith.constant 0 : i32
    return %arg0, %c0_i32, %arg2 : i32, i32, i32
  }
  func.func @transform_2(%arg0: i32, %arg1: i32, %arg2: i32) -> (i32, i32, i32) {
    %c0_i32 = arith.constant 0 : i32
    %c0_i32_0 = arith.constant 0 : i32
    return %arg0, %c0_i32, %arg2 : i32, i32, i32
  }
  func.func @transform_3(%arg0: i32, %arg1: i32, %arg2: i32) -> (i32, i32, i32) {
    %c0_i32 = arith.constant 0 : i32
    %c0_i32_0 = arith.constant 0 : i32
    return %arg0, %arg1, %c0_i32 : i32, i32, i32
  }
  func.func @transform_4(%arg0: i32, %arg1: i32, %arg2: i32) -> (i32, i32, i32, i32) {
    %c0_i32 = arith.constant 0 : i32
    %c0_i32_0 = arith.constant 0 : i32
    %c0_i32_1 = arith.constant 0 : i32
    return %arg0, %arg1, %c0_i32, %c0_i32_0 : i32, i32, i32, i32
  }
  func.func @transform_5(%arg0: i32, %arg1: i32, %arg2: i32) -> (i32, i32, i32, i32) {
    %c0_i32 = arith.constant 0 : i32
    %c0_i32_0 = arith.constant 0 : i32
    %c0_i32_1 = arith.constant 0 : i32
    return %arg0, %arg1, %c0_i32, %c0_i32_0 : i32, i32, i32, i32
  }
}

</mosaic_0001>

<bundles_post_ra>
// kernel: tpu_custom_call.1
= control target key start
LH: loop header
LB: loop body
LE: loop exit
PB: predicated region body
PF: predicated region fallthrough
CT: control target
= control target key end

     0   :  { %s1053_s0 = inlined_call_operand.hbm [shape: f32[2,8,256], index: 0, kind: input, shape index: {}]   ;;  %s1054_s1 = inlined_call_operand.vmem [shape: s32[2,1,256], index: 1, kind: input, shape index: {}]   ;;  %s1055_s2 = inlined_call_operand.vmem [shape: s8[2,1,256], index: 2, kind: input, shape index: {}]   ;;  %s1056_s3 = inlined_call_operand.vmem [shape: s32[2,8,1], index: 3, kind: input, shape index: {}]   ;;  %s1057_s4 = inlined_call_operand.vmem [shape: f32[2,1,1,1], index: 4, kind: output, shape index: {0}]   ;;  %s1058_s5 = inlined_call_operand.vmem [shape: f32[2,1,1,1], index: 5, kind: output, shape index: {1}]  }
   0x1   :  { %1061 = sst [smem:[#allocation10_spill]] %s1053_s0 }
   0x2   :  { %11 = vsyncpa [#allocation6], 0 }
   0x3   :  { %13 = vsyncpa [#allocation6 + $0x1], 0  ;;  %s891_s18 = smov 0   ;;  %s893_s19 = smov 0  }
   0x4   :  { %s895_s20 = smov 0   ;;  %s897_s21 = smov 0  }
   0x5   :  { %s899_s22 = smov 0   ;;  %s901_s23 = smov 0  }
   0x6   :  { %s903_s24 = smov 0   ;;  %s905_s25 = smov 0  }
   0x7 LB: > { %s656_s26 = sadd.s32 4294967295, %s855_s25   ;;  %s31_s27 = sadd.s32 1, %s847_s23  ;;  %s855_s25 = sphi %s905_s25, %s19_s25   ;;  %s851_s24 = sphi %s903_s24, %s1075_s24   ;;  %s847_s23 = sphi %s901_s23, %s1074_s23   ;;  %s843_s22 = sphi %s899_s22, %s1073_s22   ;;  %s839_s21 = sphi %s897_s21, %s1072_s21   ;;  %s835_s20 = sphi %s895_s20, %s1071_s20   ;;  %s831_s19 = sphi %s893_s19, %s1070_s19   ;;  %s827_s18 = sphi %s891_s18, %s1069_s18  }
   0x8   : > { %p32_p0 = scmp.ge.s32.totalorder %s31_s27, 2  ;;  %s38_s28 = sadd.s32 1, %s851_s24 }
   0x9   : > { %s49_s29 = sadd.s32 1, %s835_s20  ;;  %p56_p1 = scmp.ne.s32.totalorder %s835_s20, %s831_s19 }
   0xa   : > { %s1077_s27 = smov (%p32_p0, %s31_s27), 0  ;;  %s1079_s28 = smov (!%p32_p0, %s38_s28), %s851_s24 }
   0xb   : > { %1062 = sst [smem:[#allocation8_spill]] %s1077_s27  ;;  %s45_s30 = ssub.s32 %s847_s23, %s1077_s27 }
   0xc   : > { %p57_p2 = scmp.eq.s32.totalorder %s855_s25, 0  ;;  %p40_p3 = scmp.ge.s32.totalorder %s1079_s28, 2 }
   0xd   : > { %p62_p4 = scmp.ne.s32.totalorder %s831_s19, %s827_s18  ;;  %p63_p6 = scmp.eq.s32.totalorder %s656_s26, 0 }
   0xe   : > { %p942_p5 = por %p57_p2, %p56_p1  ;;  %s1081_s28 = smov (%p40_p3, %s1079_s28), 0 }
   0xf   : > { %1064 = sst [smem:[#allocation9_spill]] %s1081_s28  ;;  %p948_p7 = por %p63_p6, %p62_p4 }
  0x10   : > { %s42_s8 = ssub.s32 %s851_s24, %s1081_s28  ;;  %p680_p8 = scmp.lt.s32.totalorder %s855_s25, 4 }
  0x11   : > { %s46_s9 = sor.u32 %s45_s30, %s42_s8  ;;  %s226_s10 = sand.u32 1, %s835_s20  }
  0x12   : > { %p47_p9 = scmp.eq.s32.totalorder %s46_s9, 0  ;;  %s660_s11 = sshll.u32 %s226_s10, 3 }
  0x13   : > { %s661_s12 = sshll.u32 %s851_s24, 1  ;;  %s230_s16 = scalar_lea.vmem [#allocation5], %s660_s11 }
  0x14   : > { %s958_s13 = scalar_select %p47_p9, %s835_s20, %s49_s29  }
  0x15   : > { %s236_s14 = sadd.s32 %s847_s23, %s661_s12  ;;  %s242_s17 = sshll.u32 %s230_s16, 4  ;;  %s243_s17 = int_to_ptr.vmem [resolvable:$true] %s242_s17 }
  0x16   : > { %s662_s15 = sshll.u32 %s236_s14, 3  ;;  %s1066_s0 = sld [smem:[#allocation10_spill]] }
  0x17   : > { %p677_p10 = pnand %p680_p8, %p942_p5  ;;  %p663_p11 = scmp.ge.s32.totalorder %s855_s25, 1 }
  0x18   : > { %p277_p12 = scmp.lt.s32.totalorder %s855_s25, 5  ;;  %s227_s30 = scalar_lea.sflag [#allocation6], %s226_s10 }
  0x1a   : > { %p278_p13 = pnand %p663_p11, %p277_p12 }
  0x1b   : > { %s283_s29 = sand.u32 (!%p278_p13), 1, %s831_s19  }
  0x1c   : > { %s238_s27 = scalar_lea.hbm %s1066_s0, %s662_s15  ;;  %281 = sbr.rel (%p278_p13) target bundleno = 340 (0x154), region = 36 }
  0x1d   : > { %s240_s28 = sshll.u32 %s238_s27, 4  ;;  %s664_s8 = sshll.u32 (!%p278_p13), %s283_s29, 3  ;;  %s241_s28 = int_to_ptr.hbm [resolvable:$true] %s240_s28 }
  0x1e   : > { %679 = dma.hbm_to_vmem [thread:$0]  (!%p677_p10), %s241_s28, 128, %s243_s17, %s227_s30  }
  0x1f   : > { %s284_s9 = scalar_lea.sflag (!%p278_p13), [#allocation6], %s283_s29  ;;  %s287_s11 = scalar_lea.vmem (!%p278_p13), [#allocation5], %s664_s8 }
  0x21   : > { %822 = dma.done.wait (%p948_p7), %s284_s9, 128  }
  0x22   : > { %824 = vsyncadd (%p948_p7), %s284_s9, 4294967168  ;;  %p343_p0 = scmp.lt.s32.totalorder %s843_s22, 1  ;;  %p345_p1 = scmp.lt.s32.totalorder %s839_s21, 1 }
  0x23   : > { %p668_p2 = scmp.ne.s32.totalorder %s839_s21, 0 }
  0x24   : > { %s1083_s22 = smov (!%p343_p0, %s843_s22), 1 }
  0x25   : > { %s346_s27 = scalar_select %p345_p1, %s839_s21, 1 }
  0x26   : > { %s665_s28 = sshll.u32 %s1083_s22, 1  ;;  %s667_s6 = sshll.u32 %s1083_s22, 3 }
  0x27   : > { %s983_s10 = sadd.s32 %s665_s28, %s346_s27  ;;  %s363_s14 = scalar_lea.vmem %s1056_s3, %s667_s6 }
  0x28   : > { %s349_s17 = scalar_lea.vmem %s1054_s1, %s983_s10  ;;  %s356_s30 = scalar_lea.vmem %s1055_s2, %s983_s10 }
  0x29   : > { %s369_s9 = scalar_lea.vmem %s1057_s4, %s1083_s22  ;;  %s375_s0 = scalar_lea.vmem %s1058_s5, %s1083_s22 }
  0x2a   : > { %379 = sbr.rel (%p668_p2) target bundleno = 51 (0x33), region = 44 }
  0x2f   : > { %v857_v0 = vmov 0.0  }
  0x30   : > { %380 = vst [vmem:[#allocation2] sm:$0xff] %v857_v0 }
  0x31   : > { %381 = vst [vmem:[#allocation3] sm:$0xff] %v857_v0 }
  0x32   : > { %382 = vst [vmem:[#allocation4] sm:$0xff] %v857_v0 }
  0x33 PF: > { %v1005_v1 = vld [vmem:[%s363_s14] sm:$0xff]  ;;  %v858_v2 = vmov 0   ;;  %v859_v25 = vmov 0.0   ;;  %p670_p3 = scmp.ne.s32.totalorder %s839_s21, 1 }
  0x34   : > { %749 = vset.pattern.permute.xlu0 %v858_v2  ;;  %v383_v3 = vld [vmem:[%s287_s11] sm:$0xff] }
  0x35   : > { %391 = vperm.xlu0 %749, %v1005_v1   ;;  %v396_v4 = vand.u32 2147483647, %v383_v3  ;;  %v385_v9 = vld [vmem:[%s356_s30] sm:$0x1]  ;;  %vm411_vm0 = vcmp.ge.f32.partialorder %v383_v3, 0.0  ;;  %v414_v23 = vmax.f32 %v383_v3, 0.0 }
  0x36   : > { %v386_v12 = vunpack.c.0.s8 %v385_v9  ;;  %v750_v17 = vld [vmem:[%s349_s17] ss:$0 sm:$0xff] }
  0x37   : > { %v397_v5 = vsub.f32 0.0, %v396_v4  ;;  %v424_v39 = vld [vmem:[#allocation2] sm:$0xff] }
  0x38   : > { %v387_v16 = vcvt.s32.f32 %v386_v12  ;;  %v425_v30 = vld [vmem:[#allocation3] sm:$0xff] }
  0x39   : > { %v398_v6 = vmul.f32 1.442695, %v397_v5  ;;  %v426_v31 = vld [vmem:[#allocation4] sm:$0xff] }
  0x3a   : > { %v418_v24 = vperm.slane %v387_v16, 0 }
  0x3b   : > { %751 = vpow2.f32 %v398_v6 }
  0x41   : > { %v752_v7 = vpop.eup %751 }
  0x42   : > { %v400_v8 = vadd.f32 1.0, %v752_v7  ;;  %v403_v10 = vmul.f32 -0.5, %v752_v7  ;;  %v406_v18 = vand.u32 2147483647, %v752_v7 }
  0x44   : > { %753 = vrcp.f32 %v400_v8  ;;  %v404_v13 = vadd.f32 1.0, %v403_v10  ;;  %vm407_vm2 = vcmp.lt.f32.partialorder %v406_v18, 0.0004427343 }
  0x45   : > { %755 = vlog2.f32 %v400_v8 }
  0x46   : > { %v405_v21 = vmul.f32 %v752_v7, %v404_v13 }
  0x4a   : > { %v754_v11 = vpop.eup %753 }
  0x4b   : > { %v412_v14 = vmul.f32 %v754_v11, %v752_v7  ;;  %v756_v15 = vpop.eup %755 }
  0x4c   : > { %v402_v20 = vmul.f32 0.6931472, %v756_v15 }
  0x4d   : > { %v413_v22 = vsel %vm411_vm0, %v754_v11, %v412_v14 }
  0x4e   : > { %v408_v32 = vsel %vm407_vm2, %v405_v21, %v402_v20 }
  0xa7   : > { %v392_v19 = vpop.permute.xlu0 %391 }
  0xa8   : > { %vm393_vm1 = vcmp.eq.s32.totalorder %v750_v17, %v392_v19 }
  0xa9   : > { %v669_v26 = vsel %vm393_vm1, 1.0, %v859_v25 }
  0xaa   : > { %v415_v27 = vmul.f32 %v669_v26, %v383_v3  ;;  %v420_v28 = vmul.f32 %v669_v26, %v413_v22  ;;  %v422_v29 = vadd.f32 %v669_v26, %v413_v22 }
  0xac   : > { %v416_v33 = vsub.f32 %v414_v23, %v415_v27  ;;  %v421_v34 = vmul.f32 %v420_v28, %v418_v24  ;;  %v423_v35 = vmul.f32 %v422_v29, %v418_v24 }
  0xae   : > { %v417_v36 = vadd.f32 %v416_v33, %v408_v32  ;;  %v428_v37 = vadd.f32 %v425_v30, %v421_v34  ;;  %v429_v38 = vadd.f32 %v426_v31, %v423_v35 }
  0xb0   : > { %v419_v40 = vmul.f32 %v418_v24, %v417_v36  ;;  %431 = vst [vmem:[#allocation3] sm:$0xff] %v428_v37  ;;  %436 = sbr.rel (%p670_p3) target bundleno = 340 (0x154), region = 48 }
  0xb1   : > { %432 = vst [vmem:[#allocation4] sm:$0xff] %v429_v38 }
  0xb2   : > { %v427_v41 = vadd.f32 %v424_v39, %v419_v40 }
  0xb4   : > { %430 = vst [vmem:[#allocation2] sm:$0xff] %v427_v41 }
  0xb5   : > { %vm437_vm3 = vcmp.ge.s32.totalorder %v1005_v1, 0  ;;  %v860_v48 = vmov 0.0   ;;  %vm445_vm4 = vcmask 7168   ;;  %vm453_vm7 = vcmask 0  }
  0xb6   : > { %v671_v49 = vsel %vm437_vm3, 1.0, %v860_v48 }
  0xb7   : > { %v455_v44 = vld [vmem:[#allocation3] sm:$0xff] }
  0xb8   : > { %v458_v42 = vld [vmem:[#allocation4] sm:$0xff] }
  0xb9   : > { %459 = vadd.xlane.f32.xlu0 %v458_v42 }
  0xbb   : > { %v440_v43 = vld [vmem:[#allocation2] sm:$0xff] }
  0xbc   : > { %441 = vadd.xlane.f32.xlu1 %v440_v43 }
  0xc1   : > { %456 = vadd.xlane.f32.xlu0 %v455_v44 }
 0x12c   : > { %v460_v45 = vpop.xlane.xlu0 %459 }
 0x12d   : > { %v463_v47 = vadd.f32 1.0, %v460_v45 }
 0x12f   : > { %v442_v46 = vpop.xlane.xlu1 %441  ;;  %757 = vrcp.f32 %v463_v47  ;;  %v475_v61 = vand.u32 2147483648, %v463_v47  ;;  %v473_v0 = vand.u32 2147483647, %v463_v47  ;;  %vm469_vm6 = vweird.f32 %v463_v47 }
 0x130   : > { %v443_v50 = vmul.f32 0.00390625, %v442_v46 }
 0x131   : > { %v476_v4 = vor.u32 1.1754944e-38, %v475_v61  ;;  %vm474_vm9 = vcmp.eq.f32.partialorder %v473_v0, 8.507059e+37 }
 0x132   : > { %v444_v51 = vmul.f32 %v671_v49, %v443_v50 }
 0x134   : > { %v446_v52 = vsel %vm445_vm4, %v444_v51, 0.0  ;;  %v457_v55 = vpop.xlane.xlu0 %456 }
 0x135   : > { %v447_v53 = vrot.slane %v446_v52, 4  ;;  %v758_v54 = vpop.eup %757  ;;  %v461_v60 = vmul.f32 2.0, %v457_v55 }
 0x136   : > { %v465_v57 = vmul.f32 %v758_v54, %v463_v47  ;;  %vm470_vm5 = vweird.f32 %v758_v54 }
 0x137   : > { %v448_v56 = vadd.f32 %v447_v53, %v446_v52  ;;  %v462_v3 = vadd.f32 1.0, %v461_v60  ;;  %vm471_vm8 = vmor %vm469_vm6, %vm470_vm5 }
 0x138   : > { %v466_v59 = vsub.f32 1.0, %v465_v57 }
 0x139   : > { %v449_v58 = vrot.slane %v448_v56, 2 }
 0x13a   : > { %v467_v63 = vmul.f32 %v758_v54, %v466_v59 }
 0x13b   : > { %v450_v62 = vadd.f32 %v449_v58, %v448_v56 }
 0x13c   : > { %v468_v2 = vadd.f32 %v758_v54, %v467_v63 }
 0x13d   : > { %v451_v1 = vrot.slane %v450_v62, 1 }
 0x13e   : > { %v472_v6 = vsel %vm471_vm8, %v758_v54, %v468_v2 }
 0x13f   : > { %v452_v5 = vadd.f32 %v451_v1, %v450_v62  ;;  %v477_v7 = vsel %vm474_vm9, %v476_v4, %v472_v6 }
 0x140   : > { %v478_v8 = vmul.f32 %v477_v7, %v462_v3 }
 0x141   : > { %454 = vst.msk [vmem:[%s369_s9] sm:$0x1] %vm453_vm7, %v452_v5 }
 0x142   : > { %v479_v9 = vsub.f32 1.0, %v478_v8 }
 0x144   : > { %v480_v10 = vmul.f32 %v671_v49, %v479_v9 }
 0x146   : > { %v481_v11 = vsel %vm445_vm4, %v480_v10, 0.0 }
 0x147   : > { %v482_v12 = vrot.slane %v481_v11, 4 }
 0x149   : > { %v483_v13 = vadd.f32 %v482_v12, %v481_v11 }
 0x14b   : > { %v484_v14 = vrot.slane %v483_v13, 2 }
 0x14d   : > { %v485_v15 = vadd.f32 %v484_v14, %v483_v13 }
 0x14f   : > { %v486_v16 = vrot.slane %v485_v15, 1 }
 0x151   : > { %v487_v17 = vadd.f32 %v486_v16, %v485_v15 }
 0x153   : > { %488 = vst.msk [vmem:[%s375_s0] sm:$0x1] %vm453_vm7, %v487_v17 }
 0x154 PF: > { %s19_s25 = sadd.s32 1, %s855_s25   ;;  %s1067_s14 = sld [smem:[#allocation8_spill]] }
 0x155   : > { %p16_p4 = scmp.ge.s32.totalorder %s19_s25, 6   ;;  %s1068_s15 = sld [smem:[#allocation9_spill]] }
 0x156   : > { %s1069_s18 = smov %s831_s19  ;;  %s1070_s19 = smov %s835_s20 }
 0x157   : > { %s1071_s20 = smov %s958_s13  ;;  %s1072_s21 = smov %s847_s23 }
 0x158   : > { %s1073_s22 = smov %s851_s24  ;;  %18 = sbr.rel (!%p16_p4) target bundleno = 7 (0x7), region = 105 }
 0x15a   : > { %s1074_s23 = smov %s1067_s14 }
 0x15b   : > { %s1075_s24 = smov %s1068_s15 }
 0x15d   :  { %530 = vsyncpa [#allocation6], 1 }
 0x15e   :  { %532 = vsyncpa [#allocation6 + $0x1], 1 }

</bundles_post_ra>
